<compile_context>
chip_gen: v6e
topology: v6e:2x2x1
jax: 0.10.0
libtpu: 0.0.40
codegen_flags: <defaults>
</compile_context>

<pallas_src>
import jax
import jax.numpy as jnp
from jax.experimental import pallas as pl
from jax.experimental.pallas import tpu as pltpu

OBS_SIZE = 32
ACT_SIZE = 8
H1 = 400
H2 = 300

# Lane/MXU-aligned padded hidden widths (zero padding preserves the math).
H1P = 512   # K dim of the big layer-2 matmul
H2P = 384   # 3 x 128 lanes (was 512) -> 25% less L2 MXU + epilogue work


def _round_up(v, m):
    return (v + m - 1) // m * m


def ddpg_critic_kernel(x_ref, a_ref,
                       w1_ref, b1_ref,
                       w2o_ref, w2a_ref, b2_ref,
                       w3_ref, b3_ref,
                       out_ref):
    # ---- Layer 1 (MXU): obs = ReLU(x @ W1 + b1).
    # bf16 operands, f32 accumulation; bias+ReLU epilogue in f32 (v5e-safe),
    # then one bf16 cast that feeds the layer-2 matmul directly.
    obs = jnp.dot(x_ref[...].astype(jnp.bfloat16), w1_ref[...],
                  preferred_element_type=jnp.float32)
    obs = jnp.maximum(obs + b1_ref[...], 0.0).astype(jnp.bfloat16)   # (TB, H1P)

    # ---- Layer 2 (MXU x2): h = ReLU(obs @ W2_obs + a @ W2_act + b2).
    # Both terms run on the (mostly idle) MXU; the K=8 act term stays exact f32.
    h = jnp.dot(obs, w2o_ref[...], preferred_element_type=jnp.float32)
    h = h + jnp.dot(a_ref[...], w2a_ref[...],
                    preferred_element_type=jnp.float32)
    h = jnp.maximum(h + b2_ref[...], 0.0)                            # (TB, H2P) f32

    # ---- Layer 3: q = h @ w3 + b3 with N=1 -> VPU mul + XLU lane reduction.
    q = jnp.sum(h * w3_ref[...], axis=-1, keepdims=True) + b3_ref[...]   # (TB, 1)

    # Narrow (TB, 1) store: 4 B/row of HBM writeback; overlaps MXU work.
    out_ref[...] = q.astype(out_ref.dtype)


def _choose_batch_tile(B):
    """Batch tile: up to 1024 rows, but keep >=2 grid steps for larger batches
    so both v7x TensorCores are used; tiny batches get a single 8-aligned tile."""
    B8 = _round_up(B, 8)
    return min(1024, _round_up(max(B8 // 2, 8), 8))


def ddpg_critic_forward(x, a, params):
    (w1, b1, w2o, w2a, b2, w3, b3) = params
    B = x.shape[0]

    TB = _choose_batch_tile(B)
    B_pad = _round_up(B, TB)
    if B_pad != B:
        x = jnp.pad(x, ((0, B_pad - B), (0, 0)))
        a = jnp.pad(a, ((0, B_pad - B), (0, 0)))

    grid = (B_pad // TB,)

    # Weights: same block for every grid step -> stay resident in VMEM.
    def resident(arr):
        return pl.BlockSpec(arr.shape, lambda i: (0,) * arr.ndim)

    out = pl.pallas_call(
        ddpg_critic_kernel,
        out_shape=jax.ShapeDtypeStruct((B_pad, 1), jnp.float32),
        grid=grid,
        in_specs=[
            pl.BlockSpec((TB, OBS_SIZE), lambda i: (i, 0)),
            pl.BlockSpec((TB, ACT_SIZE), lambda i: (i, 0)),
            resident(w1), resident(b1),
            resident(w2o), resident(w2a), resident(b2),
            resident(w3), resident(b3),
        ],
        out_specs=pl.BlockSpec((TB, 1), lambda i: (i, 0)),
        compiler_params=pltpu.CompilerParams(
            dimension_semantics=("parallel",),
            # Headroom for large-TB intermediates/spills (well under physical
            # VMEM on all generations; v5e's default scoped limit is only 16MB).
            vmem_limit_bytes=32 * 1024 * 1024),
    )(x, a, w1, b1, w2o, w2a, b2, w3, b3)

    return out[:B]


def init_params(key, obs_size=OBS_SIZE, act_size=ACT_SIZE):
    """PyTorch-default-style init U(-1/sqrt(fan_in), 1/sqrt(fan_in)), then
    zero-pad hidden dims to lane-aligned widths.  The large MXU operands
    (w1, w2_obs) are stored bf16; the tiny w2_act stays f32 (exact a-term)."""
    ks = jax.random.split(key, 6)

    def uinit(k, shape, fan_in):
        bound = 1.0 / jnp.sqrt(jnp.float32(fan_in))
        return jax.random.uniform(k, shape, jnp.float32, -bound, bound)

    # Linear(obs_size, 400): weight stored transposed -> (obs_size, 400)
    w1 = uinit(ks[0], (obs_size, H1), obs_size)
    b1 = uinit(ks[1], (1, H1), obs_size)
    # Linear(400 + act_size, 300): split into obs / act halves of W
    fan2 = H1 + act_size
    w2_full = uinit(ks[2], (fan2, H2), fan2)
    w2o = w2_full[:H1, :]
    w2a = w2_full[H1:, :]
    b2 = uinit(ks[3], (1, H2), fan2)
    # Linear(300, 1): stored as a row vector for the in-kernel lane reduction
    w3 = uinit(ks[4], (1, H2), H2)
    b3 = uinit(ks[5], (1, 1), H2)

    # Zero-pad to H1P/H2P (ReLU(0)=0 and zero w3 tail keep results identical).
    w1p = jnp.pad(w1, ((0, 0), (0, H1P - H1))).astype(jnp.bfloat16)
    b1p = jnp.pad(b1, ((0, 0), (0, H1P - H1)))
    w2op = jnp.pad(w2o, ((0, H1P - H1), (0, H2P - H2))).astype(jnp.bfloat16)
    w2ap = jnp.pad(w2a, ((0, 0), (0, H2P - H2)))          # f32: exact a-term
    b2p = jnp.pad(b2, ((0, 0), (0, H2P - H2)))
    w3p = jnp.pad(w3, ((0, 0), (0, H2P - H2)))
    return (w1p, b1p, w2op, w2ap, b2p, w3p, b3)


def reference_forward(x, a, params):
    """Plain-XLA reference using the same weights and the same casts/ordering
    as the kernel."""
    (w1, b1, w2o, w2a, b2, w3, b3) = params
    obs = jnp.dot(x.astype(jnp.bfloat16), w1,
                  preferred_element_type=jnp.float32) + b1
    obs = jnp.maximum(obs, 0.0).astype(jnp.bfloat16)
    h = (jnp.dot(obs, w2o, preferred_element_type=jnp.float32)
         + jnp.dot(a, w2a, preferred_element_type=jnp.float32)
         + b2)
    h = jnp.maximum(h, 0.0)
    return jnp.sum(h * w3, axis=-1, keepdims=True) + b3


if __name__ == "__main__":
    key = jax.random.PRNGKey(0)
    kp, kdata = jax.random.split(key, 2)
    params = init_params(kp)

    # Small single-tile batch and a multi-tile (grid > 1, padded) batch.
    for B in (8, 300):
        kx, ka = jax.random.split(jax.random.fold_in(kdata, B), 2)
        x = jax.random.normal(kx, (B, OBS_SIZE), jnp.float32)
        a = jax.random.normal(ka, (B, ACT_SIZE), jnp.float32)

        out = jax.block_until_ready(ddpg_critic_forward(x, a, params))
        ref = reference_forward(x, a, params)

        assert out.shape == (B, 1), out.shape
        assert jnp.allclose(out, ref, atol=5e-3, rtol=5e-3), (out, ref)

    print("KERNEL_OK")
</pallas_src>

<mosaic_0001>
module attributes {stable_mosaic.version = 11 : i64} {
  func.func @ddpg_critic_kernel(%arg0: i32, %arg1: memref<8x32xf32, #tpu.memory_space<vmem>>, %arg2: memref<8x8xf32, #tpu.memory_space<vmem>>, %arg3: memref<32x512xbf16, #tpu.memory_space<vmem>>, %arg4: memref<1x512xf32, #tpu.memory_space<vmem>>, %arg5: memref<512x384xbf16, #tpu.memory_space<vmem>>, %arg6: memref<8x384xf32, #tpu.memory_space<vmem>>, %arg7: memref<1x384xf32, #tpu.memory_space<vmem>>, %arg8: memref<1x384xf32, #tpu.memory_space<vmem>>, %arg9: memref<1x1xf32, #tpu.memory_space<vmem>>, %arg10: memref<8x1xf32, #tpu.memory_space<vmem>>) attributes {dimension_semantics = [#tpu.dimension_semantics<parallel>], iteration_bounds = array<i64: 1>, scalar_prefetch = 0 : i64, scratch_operands = 0 : i64, tpu.core_type = #tpu.core_type<tc>, window_params = [{transform_indices = @transform_0, window_bounds = array<i64: 8, 32>}, {transform_indices = @transform_1, window_bounds = array<i64: 8, 8>}, {pipeline_mode = #tpu.pipeline_mode<synchronous>, transform_indices = @transform_2, window_bounds = array<i64: 32, 512>}, {pipeline_mode = #tpu.pipeline_mode<synchronous>, transform_indices = @transform_3, window_bounds = array<i64: 1, 512>}, {pipeline_mode = #tpu.pipeline_mode<synchronous>, transform_indices = @transform_4, window_bounds = array<i64: 512, 384>}, {pipeline_mode = #tpu.pipeline_mode<synchronous>, transform_indices = @transform_5, window_bounds = array<i64: 8, 384>}, {pipeline_mode = #tpu.pipeline_mode<synchronous>, transform_indices = @transform_6, window_bounds = array<i64: 1, 384>}, {pipeline_mode = #tpu.pipeline_mode<synchronous>, transform_indices = @transform_7, window_bounds = array<i64: 1, 384>}, {pipeline_mode = #tpu.pipeline_mode<synchronous>, transform_indices = @transform_8, window_bounds = array<i64: 1, 1>}, {transform_indices = @transform_9, window_bounds = array<i64: 8, 1>}]} {
    %c0 = arith.constant 0 : index
    %c0_0 = arith.constant 0 : index
    %0 = vector.load %arg1[%c0, %c0_0] : memref<8x32xf32, #tpu.memory_space<vmem>>, vector<8x32xf32>
    %1 = arith.truncf %0 : vector<8x32xf32> to vector<8x32xbf16>
    %c0_1 = arith.constant 0 : index
    %c0_2 = arith.constant 0 : index
    %2 = vector.load %arg3[%c0_1, %c0_2] : memref<32x512xbf16, #tpu.memory_space<vmem>>, vector<32x512xbf16>
    %cst = arith.constant dense<0.000000e+00> : vector<8x512xf32>
    %3 = tpu.matmul %1, %2, %cst {dimension_numbers = #tpu.dot_dimension_numbers<[1], [0], [0], [1], [0, 0, 1, 1], [], []>} : vector<8x32xbf16>, vector<32x512xbf16>, vector<8x512xf32> -> vector<8x512xf32>
    %c0_3 = arith.constant 0 : index
    %c0_4 = arith.constant 0 : index
    %4 = vector.load %arg4[%c0_3, %c0_4] : memref<1x512xf32, #tpu.memory_space<vmem>>, vector<1x512xf32>
    %5 = vector.broadcast %4 : vector<1x512xf32> to vector<8x512xf32>
    %6 = arith.addf %3, %5 : vector<8x512xf32>
    %cst_5 = arith.constant 0.000000e+00 : f32
    %7 = vector.broadcast %cst_5 : f32 to vector<8x512xf32>
    %8 = arith.maximumf %6, %7 : vector<8x512xf32>
    %9 = arith.truncf %8 : vector<8x512xf32> to vector<8x512xbf16>
    %c0_6 = arith.constant 0 : index
    %c0_7 = arith.constant 0 : index
    %10 = vector.load %arg5[%c0_6, %c0_7] : memref<512x384xbf16, #tpu.memory_space<vmem>>, vector<512x384xbf16>
    %cst_8 = arith.constant dense<0.000000e+00> : vector<8x384xf32>
    %11 = tpu.matmul %9, %10, %cst_8 {dimension_numbers = #tpu.dot_dimension_numbers<[1], [0], [0], [1], [0, 0, 1, 1], [], []>} : vector<8x512xbf16>, vector<512x384xbf16>, vector<8x384xf32> -> vector<8x384xf32>
    %c0_9 = arith.constant 0 : index
    %c0_10 = arith.constant 0 : index
    %12 = vector.load %arg2[%c0_9, %c0_10] : memref<8x8xf32, #tpu.memory_space<vmem>>, vector<8x8xf32>
    %c0_11 = arith.constant 0 : index
    %c0_12 = arith.constant 0 : index
    %13 = vector.load %arg6[%c0_11, %c0_12] : memref<8x384xf32, #tpu.memory_space<vmem>>, vector<8x384xf32>
    %cst_13 = arith.constant dense<0.000000e+00> : vector<8x384xf32>
    %14 = tpu.matmul %12, %13, %cst_13 {dimension_numbers = #tpu.dot_dimension_numbers<[1], [0], [0], [1], [0, 0, 1, 1], [], []>} : vector<8x8xf32>, vector<8x384xf32>, vector<8x384xf32> -> vector<8x384xf32>
    %15 = arith.addf %11, %14 : vector<8x384xf32>
    %c0_14 = arith.constant 0 : index
    %c0_15 = arith.constant 0 : index
    %16 = vector.load %arg7[%c0_14, %c0_15] : memref<1x384xf32, #tpu.memory_space<vmem>>, vector<1x384xf32>
    %17 = vector.broadcast %16 : vector<1x384xf32> to vector<8x384xf32>
    %18 = arith.addf %15, %17 : vector<8x384xf32>
    %cst_16 = arith.constant 0.000000e+00 : f32
    %19 = vector.broadcast %cst_16 : f32 to vector<8x384xf32>
    %20 = arith.maximumf %18, %19 : vector<8x384xf32>
    %c0_17 = arith.constant 0 : index
    %c0_18 = arith.constant 0 : index
    %21 = vector.load %arg8[%c0_17, %c0_18] : memref<1x384xf32, #tpu.memory_space<vmem>>, vector<1x384xf32>
    %22 = vector.broadcast %21 : vector<1x384xf32> to vector<8x384xf32>
    %23 = arith.mulf %20, %22 : vector<8x384xf32>
    %cst_19 = arith.constant dense<0.000000e+00> : vector<8xf32>
    %24 = vector.multi_reduction <add>, %23, %cst_19 [1] : vector<8x384xf32> to vector<8xf32>
    %25 = vector.shape_cast %24 : vector<8xf32> to vector<8x1xf32>
    %c0_20 = arith.constant 0 : index
    %c0_21 = arith.constant 0 : index
    %26 = vector.load %arg9[%c0_20, %c0_21] : memref<1x1xf32, #tpu.memory_space<vmem>>, vector<1x1xf32>
    %27 = vector.broadcast %26 : vector<1x1xf32> to vector<8x1xf32>
    %28 = arith.addf %25, %27 : vector<8x1xf32>
    %c0_22 = arith.constant 0 : index
    %c0_23 = arith.constant 0 : index
    %29 = vector.load %arg10[%c0_22, %c0_23] : memref<8x1xf32, #tpu.memory_space<vmem>>, vector<8x1xf32>
    tpu.vector_store %arg10[%c0_22, %c0_23], %28 {strides = array<i32>} : memref<8x1xf32, #tpu.memory_space<vmem>>, vector<8x1xf32>,
    return
  }
  func.func @transform_0(%arg0: i32) -> (i32, i32) {
    %c0_i32 = arith.constant 0 : i32
    %c0_i32_0 = arith.constant 0 : i32
    return %arg0, %c0_i32 : i32, i32
  }
  func.func @transform_1(%arg0: i32) -> (i32, i32) {
    %c0_i32 = arith.constant 0 : i32
    %c0_i32_0 = arith.constant 0 : i32
    return %arg0, %c0_i32 : i32, i32
  }
  func.func @transform_2(%arg0: i32) -> (i32, i32) {
    %c0_i32 = arith.constant 0 : i32
    %c0_i32_0 = arith.constant 0 : i32
    %c0_i32_1 = arith.constant 0 : i32
    return %c0_i32, %c0_i32_0 : i32, i32
  }
  func.func @transform_3(%arg0: i32) -> (i32, i32) {
    %c0_i32 = arith.constant 0 : i32
    %c0_i32_0 = arith.constant 0 : i32
    %c0_i32_1 = arith.constant 0 : i32
    return %c0_i32, %c0_i32_0 : i32, i32
  }
  func.func @transform_4(%arg0: i32) -> (i32, i32) {
    %c0_i32 = arith.constant 0 : i32
    %c0_i32_0 = arith.constant 0 : i32
    %c0_i32_1 = arith.constant 0 : i32
    return %c0_i32, %c0_i32_0 : i32, i32
  }
  func.func @transform_5(%arg0: i32) -> (i32, i32) {
    %c0_i32 = arith.constant 0 : i32
    %c0_i32_0 = arith.constant 0 : i32
    %c0_i32_1 = arith.constant 0 : i32
    return %c0_i32, %c0_i32_0 : i32, i32
  }
  func.func @transform_6(%arg0: i32) -> (i32, i32) {
    %c0_i32 = arith.constant 0 : i32
    %c0_i32_0 = arith.constant 0 : i32
    %c0_i32_1 = arith.constant 0 : i32
    return %c0_i32, %c0_i32_0 : i32, i32
  }
  func.func @transform_7(%arg0: i32) -> (i32, i32) {
    %c0_i32 = arith.constant 0 : i32
    %c0_i32_0 = arith.constant 0 : i32
    %c0_i32_1 = arith.constant 0 : i32
    return %c0_i32, %c0_i32_0 : i32, i32
  }
  func.func @transform_8(%arg0: i32) -> (i32, i32) {
    %c0_i32 = arith.constant 0 : i32
    %c0_i32_0 = arith.constant 0 : i32
    %c0_i32_1 = arith.constant 0 : i32
    return %c0_i32, %c0_i32_0 : i32, i32
  }
  func.func @transform_9(%arg0: i32) -> (i32, i32) {
    %c0_i32 = arith.constant 0 : i32
    %c0_i32_0 = arith.constant 0 : i32
    return %arg0, %c0_i32 : i32, i32
  }
}

</mosaic_0001>

<bundles_post_ra>
// kernel: tpu_custom_call.1
= control target key start
LH: loop header
LB: loop body
LE: loop exit
PB: predicated region body
PF: predicated region fallthrough
CT: control target
= control target key end

     0   :  { %s1814_s0 = inlined_call_operand.hbm [shape: f32[8,32], index: 0, kind: input, shape index: {}]   ;;  %s1815_s1 = inlined_call_operand.hbm [shape: f32[8,8], index: 1, kind: input, shape index: {}]   ;;  %s1816_s2 = inlined_call_operand.hbm [shape: bf16[32,512], index: 2, kind: input, shape index: {}]   ;;  %s1817_s3 = inlined_call_operand.vmem [shape: f32[1,512], index: 3, kind: input, shape index: {}]   ;;  %s1818_s4 = inlined_call_operand.hbm [shape: bf16[512,384], index: 4, kind: input, shape index: {}]   ;;  %s1819_s5 = inlined_call_operand.hbm [shape: f32[8,384], index: 5, kind: input, shape index: {}]   ;;  %s1820_s6 = inlined_call_operand.vmem [shape: f32[1,384], index: 6, kind: input, shape index: {}]   ;;  %s1821_s7 = inlined_call_operand.vmem [shape: f32[1,384], index: 7, kind: input, shape index: {}]   ;;  %s1822_s8 = inlined_call_operand.<no memory space> [shape: f32[1,1], index: 8, kind: input, shape index: {}]   ;;  %s1823_s9 = inlined_call_operand.vmem [shape: f32[8,1], index: 9, kind: output, shape index: {}]  }
   0x1   :  { %v14_v0 = vstv %s1822_s8 }
   0x2   :  { %15 = vst [vmem:[#allocation2] sm:$0x1] %v14_v0 }
   0x3   :  { %16 = vsyncpa [#allocation4], 0 }
   0x4   :  { %17 = vsyncpa [#allocation6], 0 }
   0x5   :  { %18 = vsyncpa [#allocation9], 0  ;;  %s1696_s11 = smov [#allocation5]   ;;  %s1697_s13 = smov [#allocation8]  }
   0x6   :  { %s35_s12 = sshll.u32 %s1696_s11, 4  ;;  %s58_s14 = sshll.u32 %s1697_s13, 4  ;;  %s36_s12 = int_to_ptr.vmem [resolvable:$true] %s35_s12  ;;  %s59_s14 = int_to_ptr.vmem [resolvable:$true] %s58_s14 }
   0x7   :  { %s1598_s15 = scalar_lea.vmem %s36_s12, 128  ;;  %p1603_p1 = scmp.lt.s32.totalorder %s36_s12, %s36_s12 }
   0x8   :  { %p1599_p0 = scmp.ne.s32.totalorder %s36_s12, %s1598_s15  ;;  %p1604_p2 = scmp.lt.s32.totalorder %s1598_s15, %s1598_s15 }
   0xa   :  { %p1605_p3 = por %p1604_p2, %p1603_p1 }
   0xc   :  { %p1606_p4 = pnand %p1605_p3, %p1599_p0 }
   0xe   :  { %1609 = shalt.err (!%p1606_p4)
}
   0xf   :  { %38 = dma.hbm_to_vmem [thread:$0]  %s1815_s1, 128, %s36_s12, [#allocation6]  }
  0x10   :  { %s1618_s8 = scalar_lea.vmem %s59_s14, 12288  ;;  %p1623_p6 = scmp.lt.s32.totalorder %s59_s14, %s59_s14 }
  0x11   :  { %p1619_p5 = scmp.ne.s32.totalorder %s59_s14, %s1618_s8  ;;  %p1624_p7 = scmp.lt.s32.totalorder %s1618_s8, %s1618_s8 }
  0x13   :  { %p1625_p8 = por %p1624_p7, %p1623_p6 }
  0x15   :  { %p1626_p9 = pnand %p1625_p8, %p1619_p5 }
  0x17   :  { %1629 = shalt.err (!%p1626_p9)
}
  0x18   :  { %s1698_s18 = smov 192   ;;  %s1699_s19 = smov 12  }
  0x19   :  { %64 = dma.hbm_to_vmem [thread:$0]  %s1818_s4, 12288, %s59_s14, [#allocation9], %s1698_s18, %s1698_s18, %s1699_s19  }
  0x1a   :  { %s1700_s22 = smov [#allocation3]   ;;  %s1701_s24 = smov [#allocation7]  }
  0x1b   :  { %s25_s23 = sshll.u32 %s1700_s22, 4  ;;  %s44_s25 = sshll.u32 %s1701_s24, 4  ;;  %s26_s23 = int_to_ptr.vmem [resolvable:$true] %s25_s23  ;;  %s45_s25 = int_to_ptr.vmem [resolvable:$true] %s44_s25 }
  0x1c   :  { %s1638_s1 = scalar_lea.vmem %s26_s23, 128  ;;  %p1643_p11 = scmp.lt.s32.totalorder %s26_s23, %s26_s23 }
  0x1d   :  { %p1639_p10 = scmp.ne.s32.totalorder %s26_s23, %s1638_s1  ;;  %p1644_p12 = scmp.lt.s32.totalorder %s1638_s1, %s1638_s1 }
  0x1f   :  { %p1645_p13 = por %p1644_p12, %p1643_p11 }
  0x21   :  { %p1646_p0 = pnand %p1645_p13, %p1639_p10 }
  0x23   :  { %1649 = shalt.err (!%p1646_p0)
}
  0x24   :  { %28 = dma.hbm_to_vmem [thread:$0]  %s1814_s0, 128, %s26_s23, [#allocation4]  }
  0x25   :  { %s1658_s28 = scalar_lea.vmem %s45_s25, 1024  ;;  %p1663_p2 = scmp.lt.s32.totalorder %s45_s25, %s45_s25 }
  0x26   :  { %p1659_p1 = scmp.ne.s32.totalorder %s45_s25, %s1658_s28  ;;  %p1664_p3 = scmp.lt.s32.totalorder %s1658_s28, %s1658_s28 }
  0x28   :  { %p1665_p4 = por %p1664_p3, %p1663_p2 }
  0x2a   :  { %p1666_p5 = pnand %p1665_p4, %p1659_p1 }
  0x2c   :  { %1669 = shalt.err (!%p1666_p5)
}
  0x2d   :  { %s1702_s4 = smov 256   ;;  %s1703_s29 = smov 16  }
  0x2e   :  { %50 = dma.hbm_to_vmem [thread:$0]  %s1816_s2, 1024, %s45_s25, [#allocation6], %s1702_s4, %s1702_s4, %s1703_s29  }
  0x2f   :  { %s1704_s11 = smov [#allocation10]  }
  0x30   :  { %s71_s12 = sshll.u32 %s1704_s11, 4  ;;  %s72_s12 = int_to_ptr.vmem [resolvable:$true] %s71_s12 }
  0x31   :  { %s1678_s13 = scalar_lea.vmem %s72_s12, 384  ;;  %p1683_p7 = scmp.lt.s32.totalorder %s72_s12, %s72_s12 }
  0x32   :  { %p1679_p6 = scmp.ne.s32.totalorder %s72_s12, %s1678_s13  ;;  %p1684_p8 = scmp.lt.s32.totalorder %s1678_s13, %s1678_s13 }
  0x34   :  { %p1685_p9 = por %p1684_p8, %p1683_p7 }
  0x36   :  { %p1686_p10 = pnand %p1685_p9, %p1679_p6 }
  0x38   :  { %1689 = shalt.err (!%p1686_p10)
}
  0x39   :  { %74 = dma.hbm_to_vmem [thread:$0]  %s1819_s5, 384, %s72_s12, [#allocation9]  }
  0x3a   :  { %1690 = dma.done.wait [#allocation4], 128  }
  0x3b   :  { %1691 = vsyncadd [#allocation4], 4294967168 }
  0x3c   :  { %1692 = dma.done.wait [#allocation6], 1152  }
  0x3d   :  { %1693 = vsyncadd [#allocation6], 4294966144 }
  0x3e   :  { %1694 = dma.done.wait [#allocation9], 12672  }
  0x3f   :  { %1695 = vsyncadd [#allocation9], 4294954624  ;;  %v1705_v1 = vmov 0   ;;  %v1450_v2 = vld [vmem:[#allocation7 + $0x24] ss:$16 sps:$4 sm:$0xff]   ;;  %v393_v11 = vld [vmem:[#allocation10 + $0x8] sm:$0xff] }
  0x40   :  { %205 = vmatprep.mubr.bf16.mxu0 %v1705_v1  ;;  %246 = vmatprep.mubr.bf16.mxu1 %v1705_v1  ;;  %v1452_v3 = vld [vmem:[#allocation7 + $0x2c] ss:$16 sps:$4 sm:$0xff]   ;;  %v1454_v4 = vld [vmem:[#allocation7 + $0x20] ss:$16 sps:$4 sm:$0xff]   ;;  %v1455_v5 = vld [vmem:[#allocation7 + $0x28] ss:$16 sps:$4 sm:$0xff]  }
  0x41   :  { %185 = vmatprep.subr.bf16.mxu0 %v1450_v2  ;;  %226 = vmatprep.subr.bf16.mxu1 %v1452_v3  ;;  %v1456_v6 = vld [vmem:[#allocation7 + $0x4] ss:$16 sps:$4 sm:$0xff]   ;;  %v1458_v7 = vld [vmem:[#allocation7 + $0xc] ss:$16 sps:$4 sm:$0xff]   ;;  %v1460_v8 = vld [vmem:[#allocation7] ss:$16 sps:$4 sm:$0xff]  }
  0x42   :  { %186 = vmatpush1.bf16.msra.mxu0 %v1454_v4  ;;  %227 = vmatpush1.bf16.msra.mxu1 %v1455_v5  ;;  %v1461_v9 = vld [vmem:[#allocation7 + $0x8] ss:$16 sps:$4 sm:$0xff]   ;;  %v97_v10 = vld [vmem:[#allocation3] sm:$0xff]  ;;  %vm169_vm0 = vcmask 261120   ;;  %v392_v13 = vld [vmem:[#allocation10] sm:$0xff]  ;;  %v1706_v14 = vmov 0.0  }
  0x43   :  { %187 = vmatprep.subr.bf16.mxu0 %v1456_v6  ;;  %228 = vmatprep.subr.bf16.mxu1 %v1458_v7  ;;  %v98_v12 = vpack.c.bf16 %v97_v10, %v97_v10  ;;  %v394_v15 = vld [vmem:[#allocation10 + $0x10] sm:$0xff]  ;;  %v1464_v16 = vld [vmem:[#allocation8 + $0xac] ss:$12 sps:$4 sm:$0xff]   ;;  %vm1707_vm1 = vmmov 0   ;;  %vm395_vm2 = vcmask 64512   ;;  %vm1269_vm3 = vcmask 7168  }
  0x44   :  { %v1467_v17 = vld [vmem:[#allocation8 + $0x22c] ss:$12 sps:$4 sm:$0xff]   ;;  %v1462_v19 = vld [vmem:[#allocation8 + $0xa8] ss:$12 sps:$4 sm:$0xff]   ;;  %v1468_v23 = vld [vmem:[#allocation8 + $0x90] ss:$12 sps:$4 sm:$0xff]  }
  0x45   :  { %v391_v18 = vld [vmem:[#allocation5] sm:$0xff]  ;;  %v1465_v20 = vld [vmem:[#allocation8 + $0x228] ss:$12 sps:$4 sm:$0xff]   ;;  %v1482_v29 = vld [vmem:[#allocation8 + $0x64] ss:$12 sps:$4 sm:$0xff]  }
  0x46   :  { %188 = vmatpush1.bf16.msra.mxu0 %v1460_v8  ;;  %229 = vmatpush1.bf16.msra.mxu1 %v1461_v9  ;;  %v1470_v21 = vld [vmem:[#allocation8 + $0x94] ss:$12 sps:$4 sm:$0xff]   ;;  %v1471_v24 = vld [vmem:[#allocation8 + $0x210] ss:$12 sps:$4 sm:$0xff]   ;;  %v1474_v27 = vld [vmem:[#allocation8 + $0x78] ss:$12 sps:$4 sm:$0xff]  }
  0x47   :  { %429 = vmatprep.subr.mxu0 %v393_v11  ;;  %1433 = vmatprep.subr.mxu1 %v1706_v14  ;;  %v1473_v22 = vld [vmem:[#allocation8 + $0x214] ss:$12 sps:$4 sm:$0xff]   ;;  %v1476_v25 = vld [vmem:[#allocation8 + $0x7c] ss:$12 sps:$4 sm:$0xff]   ;;  %v1477_v28 = vld [vmem:[#allocation8 + $0x1f8] ss:$12 sps:$4 sm:$0xff]  }
  0x48   :  { %v1479_v26 = vld [vmem:[#allocation8 + $0x1fc] ss:$12 sps:$4 sm:$0xff]   ;;  %v1485_v30 = vld [vmem:[#allocation8 + $0x1e4] ss:$12 sps:$4 sm:$0xff]   ;;  %v1480_v31 = vld [vmem:[#allocation8 + $0x60] ss:$12 sps:$4 sm:$0xff]  }
  0x49   :  { %1286 = vmatmul.mubr.msk.bf16.vlgmr.msra.gmra.mxu0 %vm169_vm0, %v98_v12  ;;  %1287 = vmatmul.mubr.msk.bf16.vlgmr.msra.gmra.mxu1 %vm169_vm0, %v98_v12  ;;  %v1483_v32 = vld [vmem:[#allocation8 + $0x1e0] ss:$12 sps:$4 sm:$0xff]   ;;  %v1486_v35 = vld [vmem:[#allocation8 + $0x48] ss:$12 sps:$4 sm:$0xff]   ;;  %v1492_v39 = vld [vmem:[#allocation8 + $0x30] ss:$12 sps:$4 sm:$0xff]  }
  0x4a   :  { %430 = vmatpush1.msra.mxu0 %v392_v13  ;;  %1434 = vmatpush3.msra.mxu1 %v394_v15  ;;  %v1488_v33 = vld [vmem:[#allocation8 + $0x4c] ss:$12 sps:$4 sm:$0xff]   ;;  %v1489_v36 = vld [vmem:[#allocation8 + $0x1c8] ss:$12 sps:$4 sm:$0xff]   ;;  %v1495_v40 = vld [vmem:[#allocation8 + $0x1b0] ss:$12 sps:$4 sm:$0xff]  }
  0x4b   :  { %463 = vmatprep.mubr.f32.mxu0 %v1706_v14  ;;  %1435 = vmatprep.mubr.msk.f32.mxu1 %vm1707_vm1, %v1706_v14  ;;  %v1491_v34 = vld [vmem:[#allocation8 + $0x1cc] ss:$12 sps:$4 sm:$0xff]   ;;  %v1494_v37 = vld [vmem:[#allocation8 + $0x34] ss:$12 sps:$4 sm:$0xff]   ;;  %v1500_v41 = vld [vmem:[#allocation8 + $0x1c] ss:$12 sps:$4 sm:$0xff]  }
  0x4c   :  { %1052 = vmatprep.subr.bf16.mxu0 %v1464_v16  ;;  %1093 = vmatprep.subr.bf16.mxu1 %v1467_v17  ;;  %v1497_v38 = vld [vmem:[#allocation8 + $0x1b4] ss:$12 sps:$4 sm:$0xff]   ;;  %v1503_v42 = vld [vmem:[#allocation8 + $0x19c] ss:$12 sps:$4 sm:$0xff]   ;;  %v1498_v43 = vld [vmem:[#allocation8 + $0x18] ss:$12 sps:$4 sm:$0xff]  }
  0x4d   :  { %v1501_v44 = vld [vmem:[#allocation8 + $0x198] ss:$12 sps:$4 sm:$0xff]   ;;  %v1504_v47 = vld [vmem:[#allocation8] ss:$12 sps:$4 sm:$0xff]   ;;  %v1510_v51 = vld [vmem:[#allocation8 + $0x168] ss:$12 sps:$4 sm:$0xff]  }
  0x4e   :  { %v1506_v45 = vld [vmem:[#allocation8 + $0x4] ss:$12 sps:$4 sm:$0xff]   ;;  %v1507_v48 = vld [vmem:[#allocation8 + $0x180] ss:$12 sps:$4 sm:$0xff]   ;;  %v1513_v52 = vld [vmem:[#allocation8 + $0x2e8] ss:$12 sps:$4 sm:$0xff]  }
  0x4f   :  { %v1509_v46 = vld [vmem:[#allocation8 + $0x184] ss:$12 sps:$4 sm:$0xff]   ;;  %v1512_v49 = vld [vmem:[#allocation8 + $0x16c] ss:$12 sps:$4 sm:$0xff]   ;;  %v1518_v53 = vld [vmem:[#allocation8 + $0x154] ss:$12 sps:$4 sm:$0xff]  }
  0x50   :  { %v1515_v50 = vld [vmem:[#allocation8 + $0x2ec] ss:$12 sps:$4 sm:$0xff]   ;;  %v1521_v54 = vld [vmem:[#allocation8 + $0x2d4] ss:$12 sps:$4 sm:$0xff]   ;;  %v1516_v55 = vld [vmem:[#allocation8 + $0x150] ss:$12 sps:$4 sm:$0xff]  }
  0x51   :  { %1288 = vmatmul.mubr.msk.f32.vlgmr.msra.gmra.mxu0 %vm395_vm2, %v391_v18  ;;  %1436 = vmatmul.mubr.msk.f32.vlgmr.msra.gmra.mxu1 %vm395_vm2, %v391_v18  ;;  %v1519_v56 = vld [vmem:[#allocation8 + $0x2d0] ss:$12 sps:$4 sm:$0xff]   ;;  %v1522_v59 = vld [vmem:[#allocation8 + $0x138] ss:$12 sps:$4 sm:$0xff]   ;;  %v1528_v63 = vld [vmem:[#allocation8 + $0x120] ss:$12 sps:$4 sm:$0xff]  }
  0x52   :  { %1053 = vmatpush1.bf16.msra.mxu0 %v1462_v19  ;;  %1094 = vmatpush1.bf16.msra.mxu1 %v1465_v20  ;;  %v1524_v57 = vld [vmem:[#allocation8 + $0x13c] ss:$12 sps:$4 sm:$0xff]   ;;  %v1525_v60 = vld [vmem:[#allocation8 + $0x2b8] ss:$12 sps:$4 sm:$0xff]   ;;  %v1531_v0 = vld [vmem:[#allocation8 + $0x2a0] ss:$12 sps:$4 sm:$0xff]   ;;  %v109_v19 = vlaneseq }
  0x53   :  { %1054 = vmatprep.subr.bf16.mxu0 %v1470_v21  ;;  %1095 = vmatprep.subr.bf16.mxu1 %v1473_v22  ;;  %v1527_v58 = vld [vmem:[#allocation8 + $0x2bc] ss:$12 sps:$4 sm:$0xff]   ;;  %v1530_v61 = vld [vmem:[#allocation8 + $0x124] ss:$12 sps:$4 sm:$0xff]   ;;  %v1536_v1 = vld [vmem:[#allocation8 + $0x10c] ss:$12 sps:$4 sm:$0xff]  }
  0x54   :  { %v1533_v62 = vld [vmem:[#allocation8 + $0x2a4] ss:$12 sps:$4 sm:$0xff]   ;;  %v1539_v2 = vld [vmem:[#allocation8 + $0x28c] ss:$12 sps:$4 sm:$0xff]   ;;  %v1534_v3 = vld [vmem:[#allocation8 + $0x108] ss:$12 sps:$4 sm:$0xff]  }
  0x55   :  { %v1537_v4 = vld [vmem:[#allocation8 + $0x288] ss:$12 sps:$4 sm:$0xff]   ;;  %v1540_v7 = vld [vmem:[#allocation8 + $0xf0] ss:$12 sps:$4 sm:$0xff]   ;;  %v1546_v11 = vld [vmem:[#allocation8 + $0xd8] ss:$12 sps:$4 sm:$0xff]  }
  0x56   :  { %1055 = vmatpush1.bf16.msra.mxu0 %v1468_v23  ;;  %1096 = vmatpush1.bf16.msra.mxu1 %v1471_v24  ;;  %v1542_v5 = vld [vmem:[#allocation8 + $0xf4] ss:$12 sps:$4 sm:$0xff]   ;;  %v1543_v8 = vld [vmem:[#allocation8 + $0x270] ss:$12 sps:$4 sm:$0xff]   ;;  %v1549_v12 = vld [vmem:[#allocation8 + $0x258] ss:$12 sps:$4 sm:$0xff]  }
  0x57   :  { %1056 = vmatprep.subr.bf16.mxu0 %v1476_v25  ;;  %1097 = vmatprep.subr.bf16.mxu1 %v1479_v26  ;;  %v1545_v6 = vld [vmem:[#allocation8 + $0x274] ss:$12 sps:$4 sm:$0xff]   ;;  %v1548_v9 = vld [vmem:[#allocation8 + $0xdc] ss:$12 sps:$4 sm:$0xff]   ;;  %v1554_v13 = vld [vmem:[#allocation8 + $0xc4] ss:$12 sps:$4 sm:$0xff]  }
  0x58   :  { %v1551_v10 = vld [vmem:[#allocation8 + $0x25c] ss:$12 sps:$4 sm:$0xff]   ;;  %v1557_v14 = vld [vmem:[#allocation8 + $0x244] ss:$12 sps:$4 sm:$0xff]   ;;  %v1552_v15 = vld [vmem:[#allocation8 + $0xc0] ss:$12 sps:$4 sm:$0xff]  }
  0x59   :  { %v1555_v16 = vld [vmem:[#allocation8 + $0x240] ss:$12 sps:$4 sm:$0xff]   ;;  %v1558_v17 = vld [vmem:[#allocation8 + $0x170] ss:$12 sps:$4 sm:$0xff]   ;;  %v110_v20 = vshrl.u32 %v109_v19, 7 }
  0x5a   :  { %1057 = vmatpush1.bf16.msra.mxu0 %v1474_v27  ;;  %1098 = vmatpush1.bf16.msra.mxu1 %v1477_v28  ;;  %v1559_v18 = vld [vmem:[#allocation8 + $0x2f0] ss:$12 sps:$4 sm:$0xff]  }
  0x5b   :  { %1058 = vmatprep.subr.bf16.mxu0 %v1482_v29  ;;  %1099 = vmatprep.subr.bf16.mxu1 %v1485_v30  ;;  %v1776_v21 = vsub.s32 0, %v110_v20  ;;  %v1778_v22 = vsub.s32 2, %v110_v20  ;;  %v107_v23 = vld [vmem:[%s1817_s3] sm:$0xf]  ;;  %v1783_v24 = vsub.s32 1, %v110_v20  ;;  %v123_v25 = vsub.s32 3, %v110_v20 }
  0x5d   :  { %v112_v26 = vrot.slane %v107_v23, %v1776_v21  ;;  %v120_v27 = vrot.slane %v107_v23, %v1778_v22  ;;  %v116_v28 = vrot.slane %v107_v23, %v1783_v24  ;;  %v124_v29 = vrot.slane %v107_v23, %v123_v25 }
  0x5e   :  { %1059 = vmatpush1.bf16.msra.mxu0 %v1480_v31  ;;  %1100 = vmatpush1.bf16.msra.mxu1 %v1483_v32 }
  0x5f   :  { %1060 = vmatprep.subr.bf16.mxu0 %v1488_v33  ;;  %1101 = vmatprep.subr.bf16.mxu1 %v1491_v34 }
  0x62   :  { %1061 = vmatpush1.bf16.msra.mxu0 %v1486_v35  ;;  %1102 = vmatpush1.bf16.msra.mxu1 %v1489_v36 }
  0x63   :  { %1062 = vmatprep.subr.bf16.mxu0 %v1494_v37  ;;  %1103 = vmatprep.subr.bf16.mxu1 %v1497_v38 }
  0x66   :  { %1063 = vmatpush1.bf16.msra.mxu0 %v1492_v39  ;;  %1104 = vmatpush1.bf16.msra.mxu1 %v1495_v40 }
  0x67   :  { %1064 = vmatprep.subr.bf16.mxu0 %v1500_v41  ;;  %1105 = vmatprep.subr.bf16.mxu1 %v1503_v42 }
  0x6a   :  { %1065 = vmatpush1.bf16.msra.mxu0 %v1498_v43  ;;  %1106 = vmatpush1.bf16.msra.mxu1 %v1501_v44 }
  0x6b   :  { %1066 = vmatprep.subr.bf16.mxu0 %v1506_v45  ;;  %1107 = vmatprep.subr.bf16.mxu1 %v1509_v46 }
  0x6e   :  { %1067 = vmatpush1.bf16.msra.mxu0 %v1504_v47  ;;  %1108 = vmatpush1.bf16.msra.mxu1 %v1507_v48 }
  0x6f   :  { %1068 = vmatprep.subr.bf16.mxu0 %v1512_v49  ;;  %1109 = vmatprep.subr.bf16.mxu1 %v1515_v50  ;;  %v1560_v49 = vld [vmem:[#allocation8 + $0xb0] ss:$12 sps:$4 sm:$0xff]  }
  0x70   :  { %v1561_v50 = vld [vmem:[#allocation8 + $0x230] ss:$12 sps:$4 sm:$0xff]  }
  0x72   :  { %1069 = vmatpush2.bf16.msra.mxu0 %v1510_v51  ;;  %1110 = vmatpush2.bf16.msra.mxu1 %v1513_v52 }
  0x73   :  { %1070 = vmatprep.subr.bf16.mxu0 %v1518_v53  ;;  %1111 = vmatprep.subr.bf16.mxu1 %v1521_v54  ;;  %v1562_v53 = vld [vmem:[#allocation8 + $0x158] ss:$12 sps:$4 sm:$0xff]  }
  0x74   :  { %v1563_v54 = vld [vmem:[#allocation8 + $0x2d8] ss:$12 sps:$4 sm:$0xff]  }
  0x76   :  { %1071 = vmatpush2.bf16.msra.mxu0 %v1516_v55  ;;  %1112 = vmatpush2.bf16.msra.mxu1 %v1519_v56  ;;  %v1564_v56 = vld [vmem:[#allocation8 + $0x98] ss:$12 sps:$4 sm:$0xff]  }
  0x77   :  { %1072 = vmatprep.subr.bf16.mxu0 %v1524_v57  ;;  %1113 = vmatprep.subr.bf16.mxu1 %v1527_v58  ;;  %v1565_v57 = vld [vmem:[#allocation8 + $0x218] ss:$12 sps:$4 sm:$0xff]   ;;  %v1566_v58 = vld [vmem:[#allocation8 + $0x140] ss:$12 sps:$4 sm:$0xff]  }
  0x7a   :  { %1073 = vmatpush2.bf16.msra.mxu0 %v1522_v59  ;;  %1114 = vmatpush2.bf16.msra.mxu1 %v1525_v60  ;;  %v1567_v59 = vld [vmem:[#allocation8 + $0x2c0] ss:$12 sps:$4 sm:$0xff]  }
  0x7b   :  { %1074 = vmatprep.subr.bf16.mxu0 %v1530_v61  ;;  %1115 = vmatprep.subr.bf16.mxu1 %v1533_v62  ;;  %v1568_v60 = vld [vmem:[#allocation8 + $0x80] ss:$12 sps:$4 sm:$0xff]   ;;  %v1570_v62 = vld [vmem:[#allocation8 + $0x128] ss:$12 sps:$4 sm:$0xff]  }
  0x7c   :  { %v1569_v61 = vld [vmem:[#allocation8 + $0x200] ss:$12 sps:$4 sm:$0xff]  }
  0x7e   :  { %1075 = vmatpush2.bf16.msra.mxu0 %v1528_v63  ;;  %1116 = vmatpush2.bf16.msra.mxu1 %v1531_v0  ;;  %v1571_v63 = vld [vmem:[#allocation8 + $0x2a8] ss:$12 sps:$4 sm:$0xff]  }
  0x7f   :  { %1076 = vmatprep.subr.bf16.mxu0 %v1536_v1  ;;  %1117 = vmatprep.subr.bf16.mxu1 %v1539_v2  ;;  %v1572_v0 = vld [vmem:[#allocation8 + $0x68] ss:$12 sps:$4 sm:$0xff]   ;;  %v1574_v2 = vld [vmem:[#allocation8 + $0x110] ss:$12 sps:$4 sm:$0xff]  }
  0x80   :  { %v1573_v1 = vld [vmem:[#allocation8 + $0x1e8] ss:$12 sps:$4 sm:$0xff]  }
  0x82   :  { %1077 = vmatpush2.bf16.msra.mxu0 %v1534_v3  ;;  %1118 = vmatpush2.bf16.msra.mxu1 %v1537_v4  ;;  %v1575_v3 = vld [vmem:[#allocation8 + $0x290] ss:$12 sps:$4 sm:$0xff]  }
  0x83   :  { %1078 = vmatprep.subr.bf16.mxu0 %v1542_v5  ;;  %1119 = vmatprep.subr.bf16.mxu1 %v1545_v6  ;;  %v1576_v4 = vld [vmem:[#allocation8 + $0x50] ss:$12 sps:$4 sm:$0xff]   ;;  %v1578_v6 = vld [vmem:[#allocation8 + $0xf8] ss:$12 sps:$4 sm:$0xff]  }
  0x84   :  { %v1577_v5 = vld [vmem:[#allocation8 + $0x1d0] ss:$12 sps:$4 sm:$0xff]  }
  0x86   :  { %1079 = vmatpush2.bf16.msra.mxu0 %v1540_v7  ;;  %1120 = vmatpush2.bf16.msra.mxu1 %v1543_v8  ;;  %v1579_v7 = vld [vmem:[#allocation8 + $0x278] ss:$12 sps:$4 sm:$0xff]  }
  0x87   :  { %1080 = vmatprep.subr.bf16.mxu0 %v1548_v9  ;;  %1121 = vmatprep.subr.bf16.mxu1 %v1551_v10  ;;  %v1580_v8 = vld [vmem:[#allocation8 + $0x38] ss:$12 sps:$4 sm:$0xff]   ;;  %v1582_v10 = vld [vmem:[#allocation8 + $0xe0] ss:$12 sps:$4 sm:$0xff]  }
  0x88   :  { %v1581_v9 = vld [vmem:[#allocation8 + $0x1b8] ss:$12 sps:$4 sm:$0xff]  }
  0x8a   :  { %1081 = vmatpush2.bf16.msra.mxu0 %v1546_v11  ;;  %1122 = vmatpush2.bf16.msra.mxu1 %v1549_v12  ;;  %v1583_v11 = vld [vmem:[#allocation8 + $0x260] ss:$12 sps:$4 sm:$0xff]  }
  0x8b   :  { %1082 = vmatprep.subr.bf16.mxu0 %v1554_v13  ;;  %1123 = vmatprep.subr.bf16.mxu1 %v1557_v14  ;;  %v1584_v12 = vld [vmem:[#allocation8 + $0x20] ss:$12 sps:$4 sm:$0xff]   ;;  %v1586_v14 = vld [vmem:[#allocation8 + $0xc8] ss:$12 sps:$4 sm:$0xff]  }
  0x8c   :  { %v1585_v13 = vld [vmem:[#allocation8 + $0x1a0] ss:$12 sps:$4 sm:$0xff]  }
  0x8e   :  { %1083 = vmatpush2.bf16.msra.mxu0 %v1552_v15  ;;  %1124 = vmatpush2.bf16.msra.mxu1 %v1555_v16  ;;  %v1587_v15 = vld [vmem:[#allocation8 + $0x248] ss:$12 sps:$4 sm:$0xff]  }
  0x8f   :  { %1389 = vmatprep.subr.bf16.mxu0 %v1558_v17  ;;  %1411 = vmatprep.subr.bf16.mxu1 %v1559_v18  ;;  %v1588_v16 = vld [vmem:[#allocation8 + $0x8] ss:$12 sps:$4 sm:$0xff]  }
  0x90   :  { %v1589_v17 = vld [vmem:[#allocation8 + $0x188] ss:$12 sps:$4 sm:$0xff]  }
 0x109   :  { %v207_v30 = vpop.f32.mrf.mxu0  ;;  %v248_v31 = vpop.f32.mrf.mxu1 }
 0x10a   :  { %v208_v32 = vadd.f32 %v207_v30, %v112_v26  ;;  %v249_v33 = vadd.f32 %v248_v31, %v120_v27 }
 0x10b   :  { %v209_v34 = vpop.f32.mrf.mxu0  ;;  %v250_v35 = vpop.f32.mrf.mxu1 }
 0x10c   :  { %v257_v36 = vmax.f32 %v249_v33, 0.0  ;;  %v210_v37 = vadd.f32 %v209_v34, %v116_v28  ;;  %v251_v38 = vadd.f32 %v250_v35, %v124_v29  ;;  %v255_v39 = vmax.f32 %v208_v32, 0.0  ;;  %v1214_v33 = vld [vmem:[%s1820_s6] sm:$0x7] }
 0x10d   :  { %v211_v40 = vpop.f32.mrf.mxu0  ;;  %v252_v41 = vpop.f32.mrf.mxu1  ;;  %v1223_v35 = vrot.slane %v1214_v33, %v1783_v24 }
 0x10e   :  { %v256_v42 = vmax.f32 %v210_v37, 0.0  ;;  %v258_v43 = vmax.f32 %v251_v38, 0.0  ;;  %v1788_v44 = vpack.c.bf16 %v257_v36, %v257_v36  ;;  %v1790_v51 = vpack.c.bf16 %v255_v39, %v255_v39 }
 0x10f   :  { %v212_v45 = vpop.f32.mrf.mxu0  ;;  %v253_v46 = vpop.f32.mrf.mxu1  ;;  %v1219_v37 = vrot.slane %v1214_v33, %v1776_v21 }
 0x110   :  { %v260_v47 = vpack.c.bf16 %v256_v42, %v256_v42  ;;  %v262_v48 = vpack.c.bf16 %v258_v43, %v258_v43  ;;  %v1237_v45 = vld [vmem:[%s1821_s7] sm:$0x7] }
 0x111   :  { %v1792_v52 = vpop.f32.mrf.mxu1  ;;  %v465_v18 = vpop.f32.mrf.mxu0 }
 0x112   :  { %1084 = vmatprep.mubr.bf16.mxu0 %v260_v47  ;;  %1125 = vmatprep.mubr.bf16.mxu1 %v262_v48 }
 0x113   :  { %1085 = vmatmul.mubr.bf16.vlgmr.msra.gmra.mxu0 %v1790_v51  ;;  %1126 = vmatmul.mubr.bf16.vlgmr.msra.gmra.mxu1 %v1788_v44  ;;  %v1437_v55 = vpop.f32.mrf.mxu1  ;;  %v467_v19 = vpop.f32.mrf.mxu0 }
 0x114   :  { %1390 = vmatpush3.bf16.msra.mxu0 %v1560_v49  ;;  %1412 = vmatpush3.bf16.msra.mxu1 %v1561_v50 }
 0x115   :  { %1166 = vmatprep.mubr.bf16.mxu0 %v260_v47  ;;  %1206 = vmatprep.mubr.bf16.mxu1 %v262_v48  ;;  %v1246_v48 = vrot.slane %v1237_v45, %v1783_v24 }
 0x116   :  { %1391 = vmatprep.subr.bf16.mxu0 %v1562_v53  ;;  %1413 = vmatprep.subr.bf16.mxu1 %v1563_v54  ;;  %v1227_v53 = vrot.slane %v1214_v33, %v1778_v22 }
 0x118   :  { %1392 = vmatpush3.bf16.msra.mxu0 %v1564_v56  ;;  %1414 = vmatpush3.bf16.msra.mxu1 %v1565_v57 }
 0x119   :  { %1393 = vmatprep.subr.bf16.mxu0 %v1566_v58  ;;  %1415 = vmatprep.subr.bf16.mxu1 %v1567_v59  ;;  %v1242_v58 = vrot.slane %v1237_v45, %v1776_v21 }
 0x11c   :  { %1394 = vmatpush3.bf16.msra.mxu0 %v1568_v60  ;;  %1416 = vmatpush3.bf16.msra.mxu1 %v1569_v61  ;;  %v1250_v60 = vrot.slane %v1237_v45, %v1778_v22 }
 0x11d   :  { %1395 = vmatprep.subr.bf16.mxu0 %v1570_v62  ;;  %1417 = vmatprep.subr.bf16.mxu1 %v1571_v63 }
 0x120   :  { %1396 = vmatpush3.bf16.msra.mxu0 %v1572_v0  ;;  %1418 = vmatpush3.bf16.msra.mxu1 %v1573_v1 }
 0x121   :  { %1397 = vmatprep.subr.bf16.mxu0 %v1574_v2  ;;  %1419 = vmatprep.subr.bf16.mxu1 %v1575_v3 }
 0x124   :  { %1398 = vmatpush3.bf16.msra.mxu0 %v1576_v4  ;;  %1420 = vmatpush3.bf16.msra.mxu1 %v1577_v5 }
 0x125   :  { %1399 = vmatprep.subr.bf16.mxu0 %v1578_v6  ;;  %1421 = vmatprep.subr.bf16.mxu1 %v1579_v7 }
 0x128   :  { %1400 = vmatpush3.bf16.msra.mxu0 %v1580_v8  ;;  %1422 = vmatpush3.bf16.msra.mxu1 %v1581_v9 }
 0x129   :  { %1401 = vmatprep.subr.bf16.mxu0 %v1582_v10  ;;  %1423 = vmatprep.subr.bf16.mxu1 %v1583_v11 }
 0x12c   :  { %1402 = vmatpush3.bf16.msra.mxu0 %v1584_v12  ;;  %1424 = vmatpush3.bf16.msra.mxu1 %v1585_v13 }
 0x12d   :  { %1403 = vmatprep.subr.bf16.mxu0 %v1586_v14  ;;  %1425 = vmatprep.subr.bf16.mxu1 %v1587_v15 }
 0x130   :  { %1404 = vmatpush3.bf16.msra.mxu0 %v1588_v16  ;;  %1426 = vmatpush3.bf16.msra.mxu1 %v1589_v17 }
 0x133   :  { %1167 = vmatmul.mubr.bf16.vlgmr.msra.gmra.mxu0 %v1790_v51  ;;  %1207 = vmatmul.mubr.bf16.vlgmr.msra.gmra.mxu1 %v1788_v44 }
 0x1d3   :  { %v1086_v20 = vpop.f32.mrf.mxu0  ;;  %v1127_v23 = vpop.f32.mrf.mxu1 }
 0x1d4   :  { %v1087_v32 = vadd.f32 %v1086_v20, %v465_v18 }
 0x1d5   :  { %v1088_v25 = vpop.f32.mrf.mxu0  ;;  %v1129_v26 = vpop.f32.mrf.mxu1 }
 0x1d6   :  { %v1089_v31 = vadd.f32 %v1088_v25, %v467_v19  ;;  %v1128_v36 = vadd.f32 %v1127_v23, %v1087_v32 }
 0x1d7   :  { %v1090_v27 = vpop.f32.mrf.mxu0  ;;  %v1131_v28 = vpop.f32.mrf.mxu1 }
 0x1d8   :  { %v1130_v34 = vadd.f32 %v1129_v26, %v1089_v31  ;;  %v1231_v43 = vadd.f32 %v1219_v37, %v1128_v36 }
 0x1d9   :  { %v1091_v29 = vpop.f32.mrf.mxu0  ;;  %v1132_v30 = vpop.f32.mrf.mxu1 }
 0x1da   :  { %v1232_v40 = vadd.f32 %v1223_v35, %v1130_v34  ;;  %v1234_v56 = vmax.f32 %v1231_v43, 0.0 }
 0x1dc   :  { %v1235_v49 = vmax.f32 %v1232_v40, 0.0  ;;  %v1254_v63 = vmul.f32 %v1242_v58, %v1234_v56 }
 0x1de   :  { %v1255_v61 = vmul.f32 %v1246_v48, %v1235_v49 }
 0x1e0   :  { %v1257_v24 = vadd.f32 %v1255_v61, %v1254_v63 }
 0x1f3   :  { %v1405_v38 = vpop.f32.mrf.mxu0  ;;  %v1427_v39 = vpop.f32.mrf.mxu1 }
 0x1f5   :  { %v1406_v41 = vpop.f32.mrf.mxu0  ;;  %v1428_v42 = vpop.f32.mrf.mxu1 }
 0x1f6   :  { %v1407_v44 = vadd.f32 %v1406_v41, %v1405_v38  ;;  %v1429_v51 = vadd.f32 %v1428_v42, %v1427_v39 }
 0x1f7   :  { %v1408_v46 = vpop.f32.mrf.mxu0  ;;  %v1430_v47 = vpop.f32.mrf.mxu1 }
 0x1f8   :  { %v1169_v50 = vadd.f32 %v1407_v44, %v1792_v52  ;;  %v1386_v52 = vld [vmem:[#allocation2] ss:$0 sm:$0xff] }
 0x1f9   :  { %v1409_v54 = vpop.f32.mrf.mxu0  ;;  %v1431_v55 = vpop.f32.mrf.mxu1 }
 0x1fa   :  { %v1209_v57 = vadd.f32 %v1429_v51, %v1169_v50 }
 0x1fc   :  { %v1233_v59 = vadd.f32 %v1227_v53, %v1209_v57 }
 0x1fe   :  { %v1236_v62 = vmax.f32 %v1233_v59, 0.0 }
 0x200   :  { %v1256_v0 = vmul.f32 %v1250_v60, %v1236_v62 }
 0x202   :  { %v1258_v1 = vadd.f32 %v1257_v24, %v1256_v0 }
 0x204   :  { %1259 = vadd.xlane.f32.xlu0 %v1258_v1 }
 0x28d   :  { %v1260_v2 = vpop.xlane.xlu0 %1259 }
 0x28e   :  { %v1268_v3 = vadd.f32 %v1386_v52, %v1260_v2 }
 0x290   :  { %1270 = vst.msk [vmem:[%s1823_s9] sm:$0xff] %vm1269_vm3, %v1268_v3 }
 0x291   :  { %1275 = vsyncpa [#allocation4], 1 }
 0x292   :  { %1276 = vsyncpa [#allocation6], 1 }
 0x293   :  { %1277 = vsyncpa [#allocation9], 1 }

</bundles_post_ra>
